<compile_context>
chip_gen: v5e
topology: v5e:2x2
jax: 0.10.0
libtpu: 0.0.40
codegen_flags: <defaults>
</compile_context>

<pallas_src>
import functools

import jax
import jax.numpy as jnp
import numpy as np
from jax.experimental import pallas as pl
from jax.experimental.pallas import tpu as pltpu


# ----------------------------- kernel -----------------------------
def _shift_kernel(s_ref, x_ref, o_ref, *, b, c, h, w):
    """One grid step = B consecutive samples.

    s_ref: (2*N_pad,) int32 SMEM scalar prefetch: [sx_0, sy_0, sx_1, sy_1, ...].
    x_ref: (B, C, Hp, Wp) f32 replicate-padded images (Hp = H+2p, Wp = W+2p).
    o_ref: (C*H, B*W) f32 lane-dense output slab; sample b occupies lanes [b*W, (b+1)*W).
    """
    g = pl.program_id(0)
    wp = x_ref.shape[-1]
    lanes = b * w

    # Loop-invariant iotas for the one-hot column selectors (hoisted out of the loop).
    src = jax.lax.broadcasted_iota(jnp.int32, (wp, lanes), 0)   # padded source column
    dst = jax.lax.broadcasted_iota(jnp.int32, (wp, lanes), 1)   # output lane

    acc = jnp.zeros((c * h, lanes), jnp.float32)
    for bi in range(b):                      # static unroll over samples in this block
        idx = g * b + bi
        sx = s_ref[2 * idx]                  # width shift  (grid x), in [0, 2*pad]
        sy = s_ref[2 * idx + 1]              # height shift (grid y), in [0, 2*pad]

        # Height crop: dynamic sublane slice of the padded image (no row matmul).
        xb = x_ref[bi, :, pl.ds(sy, h), :].reshape(c * h, wp)   # (C*H, Wp)

        # Width crop + lane placement in a single small MXU matmul:
        #   sel[l, bi*W + j] = 1  iff  l == j + sx   (zero outside sample bi's lane band)
        in_band = (dst >= bi * w) & (dst < (bi + 1) * w)
        sel = (in_band & (src == dst - bi * w + sx)).astype(jnp.float32)  # (Wp, B*W)
        acc = acc + jnp.dot(xb, sel, preferred_element_type=jnp.float32)

    o_ref[...] = acc.astype(o_ref.dtype)     # one full-width (128-lane) store


# ----------------------------- wrapper -----------------------------
def random_shifts_aug(x, shifts, pad, samples_per_step=None):
    """x: (N, C, H, W) f32, H == W. shifts: (N, 2) int32, col 0 = x-shift, col 1 = y-shift."""
    n, c, h, w = x.shape
    assert h == w
    hp, wp = h + 2 * pad, w + 2 * pad

    # Samples per grid step: make the output slab lane width b*w >= 128 (lane-dense),
    # capped by batch size.  Re-derive (shrink b) for very large C*H*W on v7x (64 MiB VMEM).
    if samples_per_step is None:
        b = 1 if w >= 128 else min(n, pl.cdiv(128, w))
    else:
        b = samples_per_step
    steps = pl.cdiv(n, b)
    n_pad = steps * b

    # Replicate-pad spatially once, outside the kernel (pure XLA layout plumbing).
    xp = jnp.pad(x, ((0, 0), (0, 0), (pad, pad), (pad, pad)), mode="edge")
    # Clamp shifts to the valid range (replicate semantics) and flatten for SMEM.
    s_flat = jnp.clip(shifts.astype(jnp.int32), 0, 2 * pad).reshape(-1)
    if n_pad > n:
        xp = jnp.pad(xp, ((0, n_pad - n), (0, 0), (0, 0), (0, 0)))
        s_flat = jnp.pad(s_flat, (0, 2 * (n_pad - n)))

    lanes = b * w
    grid_spec = pltpu.PrefetchScalarGridSpec(
        num_scalar_prefetch=1,                              # shift table lands in SMEM
        grid=(steps,),
        in_specs=[pl.BlockSpec((b, c, hp, wp), lambda g, s: (g, 0, 0, 0))],
        out_specs=pl.BlockSpec((None, c * h, lanes), lambda g, s: (g, 0, 0)),
    )

    out = pl.pallas_call(
        functools.partial(_shift_kernel, b=b, c=c, h=h, w=w),
        grid_spec=grid_spec,
        out_shape=jax.ShapeDtypeStruct((steps, c * h, lanes), x.dtype),
        compiler_params=pltpu.CompilerParams(
            dimension_semantics=("parallel",),              # batch-block axis across TCs (v7x)
        ),
    )(s_flat, xp)

    # (steps, C*H, B*W) -> (N, C, H, W): layout plumbing outside the kernel.
    out = out.reshape(steps, c, h, b, w).transpose(0, 3, 1, 2, 4).reshape(n_pad, c, h, w)
    return out[:n]


# ----------------------------- main -----------------------------
if __name__ == "__main__":
    N, C, H, W, PAD = 16, 4, 16, 16, 4

    key = jax.random.PRNGKey(0)
    kx, ks = jax.random.split(key)
    x = jax.random.normal(kx, (N, C, H, W), jnp.float32)
    # torch.randint(0, 2*pad+1, (n,1,1,2)) — randomness supplied externally via jax.random
    # (same distribution; the module's internal global RNG has no in-kernel equivalent).
    shifts = jax.random.randint(ks, (N, 2), 0, 2 * PAD + 1, dtype=jnp.int32)

    out = random_shifts_aug(x, shifts, PAD)
    jax.block_until_ready(out)

    # Reference: replicate-pad + per-sample integer crop (exact semantics of the module).
    x_np = np.asarray(x)
    s_np = np.asarray(shifts)
    xpad = np.pad(x_np, ((0, 0), (0, 0), (PAD, PAD), (PAD, PAD)), mode="edge")
    ref = np.stack(
        [xpad[i, :, s_np[i, 1]:s_np[i, 1] + H, s_np[i, 0]:s_np[i, 0] + W] for i in range(N)]
    )

    o_np = np.asarray(out)
    assert out.shape == (N, C, H, W)
    assert np.all(np.isfinite(o_np))
    assert np.max(np.abs(o_np - ref)) <= 1e-5
    print("KERNEL_OK")
</pallas_src>

<mosaic_0001>
module attributes {stable_mosaic.version = 11 : i64} {
  func.func @_shift_kernel(%arg0: i32, %arg1: memref<32xi32, #tpu.memory_space<smem>>, %arg2: memref<8x4x24x24xf32, #tpu.memory_space<vmem>>, %arg3: memref<1x64x128xf32, #tpu.memory_space<vmem>>) attributes {dimension_semantics = [#tpu.dimension_semantics<parallel>], iteration_bounds = array<i64: 2>, scalar_prefetch = 1 : i64, scratch_operands = 0 : i64, tpu.core_type = #tpu.core_type<tc>, window_params = [{transform_indices = @transform_0, window_bounds = array<i64: 8, 4, 24, 24>}, {transform_indices = @transform_1, window_bounds = array<i64: 1, 64, 128>}]} {
    %0 = tpu.iota {dimensions = array<i32: 0>} : vector<24x128xi32>
    %1 = tpu.iota {dimensions = array<i32: 1>} : vector<24x128xi32>
    %cst = arith.constant 0.000000e+00 : f32
    %2 = vector.broadcast %cst : f32 to vector<64x128xf32>
    %c8_i32 = arith.constant 8 : i32
    %3 = arith.muli %arg0, %c8_i32 : i32
    %c0_i32 = arith.constant 0 : i32
    %4 = arith.addi %3, %c0_i32 : i32
    %c2_i32 = arith.constant 2 : i32
    %5 = arith.muli %c2_i32, %4 : i32
    %6 = arith.index_cast %5 : i32 to index
    %7 = memref.load %arg1[%6] : memref<32xi32, #tpu.memory_space<smem>>
    %c2_i32_0 = arith.constant 2 : i32
    %8 = arith.muli %c2_i32_0, %4 : i32
    %c1_i32 = arith.constant 1 : i32
    %9 = arith.addi %8, %c1_i32 : i32
    %10 = arith.index_cast %9 : i32 to index
    %11 = memref.load %arg1[%10] : memref<32xi32, #tpu.memory_space<smem>>
    %c0 = arith.constant 0 : index
    %c0_1 = arith.constant 0 : index
    %12 = arith.index_cast %11 : i32 to index
    %c0_2 = arith.constant 0 : index
    %13 = vector.load %arg2[%c0, %c0_1, %12, %c0_2] : memref<8x4x24x24xf32, #tpu.memory_space<vmem>>, vector<1x4x16x24xf32>
    %14 = vector.shape_cast %13 : vector<1x4x16x24xf32> to vector<4x16x24xf32>
    %15 = vector.shape_cast %14 : vector<4x16x24xf32> to vector<64x24xf32>
    %c0_i32_3 = arith.constant 0 : i32
    %16 = vector.broadcast %c0_i32_3 : i32 to vector<24x128xi32>
    %17 = arith.cmpi sge, %1, %16 : vector<24x128xi32>
    %c16_i32 = arith.constant 16 : i32
    %18 = vector.broadcast %c16_i32 : i32 to vector<24x128xi32>
    %19 = arith.cmpi slt, %1, %18 : vector<24x128xi32>
    %20 = arith.andi %17, %19 : vector<24x128xi1>
    %c0_i32_4 = arith.constant 0 : i32
    %21 = vector.broadcast %c0_i32_4 : i32 to vector<24x128xi32>
    %22 = arith.subi %1, %21 : vector<24x128xi32>
    %23 = vector.broadcast %7 : i32 to vector<24x128xi32>
    %24 = arith.addi %22, %23 : vector<24x128xi32>
    %25 = arith.cmpi eq, %0, %24 : vector<24x128xi32>
    %26 = arith.andi %20, %25 : vector<24x128xi1>
    %27 = arith.extui %26 : vector<24x128xi1> to vector<24x128xi32>
    %28 = arith.sitofp %27 : vector<24x128xi32> to vector<24x128xf32>
    %cst_5 = arith.constant dense<0.000000e+00> : vector<64x128xf32>
    %29 = tpu.matmul %15, %28, %cst_5 {dimension_numbers = #tpu.dot_dimension_numbers<[1], [0], [0], [1], [0, 0, 1, 1], [], []>} : vector<64x24xf32>, vector<24x128xf32>, vector<64x128xf32> -> vector<64x128xf32>
    %30 = arith.addf %2, %29 : vector<64x128xf32>
    %c8_i32_6 = arith.constant 8 : i32
    %31 = arith.muli %arg0, %c8_i32_6 : i32
    %c1_i32_7 = arith.constant 1 : i32
    %32 = arith.addi %31, %c1_i32_7 : i32
    %c2_i32_8 = arith.constant 2 : i32
    %33 = arith.muli %c2_i32_8, %32 : i32
    %34 = arith.index_cast %33 : i32 to index
    %35 = memref.load %arg1[%34] : memref<32xi32, #tpu.memory_space<smem>>
    %c2_i32_9 = arith.constant 2 : i32
    %36 = arith.muli %c2_i32_9, %32 : i32
    %c1_i32_10 = arith.constant 1 : i32
    %37 = arith.addi %36, %c1_i32_10 : i32
    %38 = arith.index_cast %37 : i32 to index
    %39 = memref.load %arg1[%38] : memref<32xi32, #tpu.memory_space<smem>>
    %c1 = arith.constant 1 : index
    %c0_11 = arith.constant 0 : index
    %40 = arith.index_cast %39 : i32 to index
    %c0_12 = arith.constant 0 : index
    %41 = vector.load %arg2[%c1, %c0_11, %40, %c0_12] : memref<8x4x24x24xf32, #tpu.memory_space<vmem>>, vector<1x4x16x24xf32>
    %42 = vector.shape_cast %41 : vector<1x4x16x24xf32> to vector<4x16x24xf32>
    %43 = vector.shape_cast %42 : vector<4x16x24xf32> to vector<64x24xf32>
    %c16_i32_13 = arith.constant 16 : i32
    %44 = vector.broadcast %c16_i32_13 : i32 to vector<24x128xi32>
    %45 = arith.cmpi sge, %1, %44 : vector<24x128xi32>
    %c32_i32 = arith.constant 32 : i32
    %46 = vector.broadcast %c32_i32 : i32 to vector<24x128xi32>
    %47 = arith.cmpi slt, %1, %46 : vector<24x128xi32>
    %48 = arith.andi %45, %47 : vector<24x128xi1>
    %c16_i32_14 = arith.constant 16 : i32
    %49 = vector.broadcast %c16_i32_14 : i32 to vector<24x128xi32>
    %50 = arith.subi %1, %49 : vector<24x128xi32>
    %51 = vector.broadcast %35 : i32 to vector<24x128xi32>
    %52 = arith.addi %50, %51 : vector<24x128xi32>
    %53 = arith.cmpi eq, %0, %52 : vector<24x128xi32>
    %54 = arith.andi %48, %53 : vector<24x128xi1>
    %55 = arith.extui %54 : vector<24x128xi1> to vector<24x128xi32>
    %56 = arith.sitofp %55 : vector<24x128xi32> to vector<24x128xf32>
    %cst_15 = arith.constant dense<0.000000e+00> : vector<64x128xf32>
    %57 = tpu.matmul %43, %56, %cst_15 {dimension_numbers = #tpu.dot_dimension_numbers<[1], [0], [0], [1], [0, 0, 1, 1], [], []>} : vector<64x24xf32>, vector<24x128xf32>, vector<64x128xf32> -> vector<64x128xf32>
    %58 = arith.addf %30, %57 : vector<64x128xf32>
    %c8_i32_16 = arith.constant 8 : i32
    %59 = arith.muli %arg0, %c8_i32_16 : i32
    %c2_i32_17 = arith.constant 2 : i32
    %60 = arith.addi %59, %c2_i32_17 : i32
    %c2_i32_18 = arith.constant 2 : i32
    %61 = arith.muli %c2_i32_18, %60 : i32
    %62 = arith.index_cast %61 : i32 to index
    %63 = memref.load %arg1[%62] : memref<32xi32, #tpu.memory_space<smem>>
    %c2_i32_19 = arith.constant 2 : i32
    %64 = arith.muli %c2_i32_19, %60 : i32
    %c1_i32_20 = arith.constant 1 : i32
    %65 = arith.addi %64, %c1_i32_20 : i32
    %66 = arith.index_cast %65 : i32 to index
    %67 = memref.load %arg1[%66] : memref<32xi32, #tpu.memory_space<smem>>
    %c2 = arith.constant 2 : index
    %c0_21 = arith.constant 0 : index
    %68 = arith.index_cast %67 : i32 to index
    %c0_22 = arith.constant 0 : index
    %69 = vector.load %arg2[%c2, %c0_21, %68, %c0_22] : memref<8x4x24x24xf32, #tpu.memory_space<vmem>>, vector<1x4x16x24xf32>
    %70 = vector.shape_cast %69 : vector<1x4x16x24xf32> to vector<4x16x24xf32>
    %71 = vector.shape_cast %70 : vector<4x16x24xf32> to vector<64x24xf32>
    %c32_i32_23 = arith.constant 32 : i32
    %72 = vector.broadcast %c32_i32_23 : i32 to vector<24x128xi32>
    %73 = arith.cmpi sge, %1, %72 : vector<24x128xi32>
    %c48_i32 = arith.constant 48 : i32
    %74 = vector.broadcast %c48_i32 : i32 to vector<24x128xi32>
    %75 = arith.cmpi slt, %1, %74 : vector<24x128xi32>
    %76 = arith.andi %73, %75 : vector<24x128xi1>
    %c32_i32_24 = arith.constant 32 : i32
    %77 = vector.broadcast %c32_i32_24 : i32 to vector<24x128xi32>
    %78 = arith.subi %1, %77 : vector<24x128xi32>
    %79 = vector.broadcast %63 : i32 to vector<24x128xi32>
    %80 = arith.addi %78, %79 : vector<24x128xi32>
    %81 = arith.cmpi eq, %0, %80 : vector<24x128xi32>
    %82 = arith.andi %76, %81 : vector<24x128xi1>
    %83 = arith.extui %82 : vector<24x128xi1> to vector<24x128xi32>
    %84 = arith.sitofp %83 : vector<24x128xi32> to vector<24x128xf32>
    %cst_25 = arith.constant dense<0.000000e+00> : vector<64x128xf32>
    %85 = tpu.matmul %71, %84, %cst_25 {dimension_numbers = #tpu.dot_dimension_numbers<[1], [0], [0], [1], [0, 0, 1, 1], [], []>} : vector<64x24xf32>, vector<24x128xf32>, vector<64x128xf32> -> vector<64x128xf32>
    %86 = arith.addf %58, %85 : vector<64x128xf32>
    %c8_i32_26 = arith.constant 8 : i32
    %87 = arith.muli %arg0, %c8_i32_26 : i32
    %c3_i32 = arith.constant 3 : i32
    %88 = arith.addi %87, %c3_i32 : i32
    %c2_i32_27 = arith.constant 2 : i32
    %89 = arith.muli %c2_i32_27, %88 : i32
    %90 = arith.index_cast %89 : i32 to index
    %91 = memref.load %arg1[%90] : memref<32xi32, #tpu.memory_space<smem>>
    %c2_i32_28 = arith.constant 2 : i32
    %92 = arith.muli %c2_i32_28, %88 : i32
    %c1_i32_29 = arith.constant 1 : i32
    %93 = arith.addi %92, %c1_i32_29 : i32
    %94 = arith.index_cast %93 : i32 to index
    %95 = memref.load %arg1[%94] : memref<32xi32, #tpu.memory_space<smem>>
    %c3 = arith.constant 3 : index
    %c0_30 = arith.constant 0 : index
    %96 = arith.index_cast %95 : i32 to index
    %c0_31 = arith.constant 0 : index
    %97 = vector.load %arg2[%c3, %c0_30, %96, %c0_31] : memref<8x4x24x24xf32, #tpu.memory_space<vmem>>, vector<1x4x16x24xf32>
    %98 = vector.shape_cast %97 : vector<1x4x16x24xf32> to vector<4x16x24xf32>
    %99 = vector.shape_cast %98 : vector<4x16x24xf32> to vector<64x24xf32>
    %c48_i32_32 = arith.constant 48 : i32
    %100 = vector.broadcast %c48_i32_32 : i32 to vector<24x128xi32>
    %101 = arith.cmpi sge, %1, %100 : vector<24x128xi32>
    %c64_i32 = arith.constant 64 : i32
    %102 = vector.broadcast %c64_i32 : i32 to vector<24x128xi32>
    %103 = arith.cmpi slt, %1, %102 : vector<24x128xi32>
    %104 = arith.andi %101, %103 : vector<24x128xi1>
    %c48_i32_33 = arith.constant 48 : i32
    %105 = vector.broadcast %c48_i32_33 : i32 to vector<24x128xi32>
    %106 = arith.subi %1, %105 : vector<24x128xi32>
    %107 = vector.broadcast %91 : i32 to vector<24x128xi32>
    %108 = arith.addi %106, %107 : vector<24x128xi32>
    %109 = arith.cmpi eq, %0, %108 : vector<24x128xi32>
    %110 = arith.andi %104, %109 : vector<24x128xi1>
    %111 = arith.extui %110 : vector<24x128xi1> to vector<24x128xi32>
    %112 = arith.sitofp %111 : vector<24x128xi32> to vector<24x128xf32>
    %cst_34 = arith.constant dense<0.000000e+00> : vector<64x128xf32>
    %113 = tpu.matmul %99, %112, %cst_34 {dimension_numbers = #tpu.dot_dimension_numbers<[1], [0], [0], [1], [0, 0, 1, 1], [], []>} : vector<64x24xf32>, vector<24x128xf32>, vector<64x128xf32> -> vector<64x128xf32>
    %114 = arith.addf %86, %113 : vector<64x128xf32>
    %c8_i32_35 = arith.constant 8 : i32
    %115 = arith.muli %arg0, %c8_i32_35 : i32
    %c4_i32 = arith.constant 4 : i32
    %116 = arith.addi %115, %c4_i32 : i32
    %c2_i32_36 = arith.constant 2 : i32
    %117 = arith.muli %c2_i32_36, %116 : i32
    %118 = arith.index_cast %117 : i32 to index
    %119 = memref.load %arg1[%118] : memref<32xi32, #tpu.memory_space<smem>>
    %c2_i32_37 = arith.constant 2 : i32
    %120 = arith.muli %c2_i32_37, %116 : i32
    %c1_i32_38 = arith.constant 1 : i32
    %121 = arith.addi %120, %c1_i32_38 : i32
    %122 = arith.index_cast %121 : i32 to index
    %123 = memref.load %arg1[%122] : memref<32xi32, #tpu.memory_space<smem>>
    %c4 = arith.constant 4 : index
    %c0_39 = arith.constant 0 : index
    %124 = arith.index_cast %123 : i32 to index
    %c0_40 = arith.constant 0 : index
    %125 = vector.load %arg2[%c4, %c0_39, %124, %c0_40] : memref<8x4x24x24xf32, #tpu.memory_space<vmem>>, vector<1x4x16x24xf32>
    %126 = vector.shape_cast %125 : vector<1x4x16x24xf32> to vector<4x16x24xf32>
    %127 = vector.shape_cast %126 : vector<4x16x24xf32> to vector<64x24xf32>
    %c64_i32_41 = arith.constant 64 : i32
    %128 = vector.broadcast %c64_i32_41 : i32 to vector<24x128xi32>
    %129 = arith.cmpi sge, %1, %128 : vector<24x128xi32>
    %c80_i32 = arith.constant 80 : i32
    %130 = vector.broadcast %c80_i32 : i32 to vector<24x128xi32>
    %131 = arith.cmpi slt, %1, %130 : vector<24x128xi32>
    %132 = arith.andi %129, %131 : vector<24x128xi1>
    %c64_i32_42 = arith.constant 64 : i32
    %133 = vector.broadcast %c64_i32_42 : i32 to vector<24x128xi32>
    %134 = arith.subi %1, %133 : vector<24x128xi32>
    %135 = vector.broadcast %119 : i32 to vector<24x128xi32>
    %136 = arith.addi %134, %135 : vector<24x128xi32>
    %137 = arith.cmpi eq, %0, %136 : vector<24x128xi32>
    %138 = arith.andi %132, %137 : vector<24x128xi1>
    %139 = arith.extui %138 : vector<24x128xi1> to vector<24x128xi32>
    %140 = arith.sitofp %139 : vector<24x128xi32> to vector<24x128xf32>
    %cst_43 = arith.constant dense<0.000000e+00> : vector<64x128xf32>
    %141 = tpu.matmul %127, %140, %cst_43 {dimension_numbers = #tpu.dot_dimension_numbers<[1], [0], [0], [1], [0, 0, 1, 1], [], []>} : vector<64x24xf32>, vector<24x128xf32>, vector<64x128xf32> -> vector<64x128xf32>
    %142 = arith.addf %114, %141 : vector<64x128xf32>
    %c8_i32_44 = arith.constant 8 : i32
    %143 = arith.muli %arg0, %c8_i32_44 : i32
    %c5_i32 = arith.constant 5 : i32
    %144 = arith.addi %143, %c5_i32 : i32
    %c2_i32_45 = arith.constant 2 : i32
    %145 = arith.muli %c2_i32_45, %144 : i32
    %146 = arith.index_cast %145 : i32 to index
    %147 = memref.load %arg1[%146] : memref<32xi32, #tpu.memory_space<smem>>
    %c2_i32_46 = arith.constant 2 : i32
    %148 = arith.muli %c2_i32_46, %144 : i32
    %c1_i32_47 = arith.constant 1 : i32
    %149 = arith.addi %148, %c1_i32_47 : i32
    %150 = arith.index_cast %149 : i32 to index
    %151 = memref.load %arg1[%150] : memref<32xi32, #tpu.memory_space<smem>>
    %c5 = arith.constant 5 : index
    %c0_48 = arith.constant 0 : index
    %152 = arith.index_cast %151 : i32 to index
    %c0_49 = arith.constant 0 : index
    %153 = vector.load %arg2[%c5, %c0_48, %152, %c0_49] : memref<8x4x24x24xf32, #tpu.memory_space<vmem>>, vector<1x4x16x24xf32>
    %154 = vector.shape_cast %153 : vector<1x4x16x24xf32> to vector<4x16x24xf32>
    %155 = vector.shape_cast %154 : vector<4x16x24xf32> to vector<64x24xf32>
    %c80_i32_50 = arith.constant 80 : i32
    %156 = vector.broadcast %c80_i32_50 : i32 to vector<24x128xi32>
    %157 = arith.cmpi sge, %1, %156 : vector<24x128xi32>
    %c96_i32 = arith.constant 96 : i32
    %158 = vector.broadcast %c96_i32 : i32 to vector<24x128xi32>
    %159 = arith.cmpi slt, %1, %158 : vector<24x128xi32>
    %160 = arith.andi %157, %159 : vector<24x128xi1>
    %c80_i32_51 = arith.constant 80 : i32
    %161 = vector.broadcast %c80_i32_51 : i32 to vector<24x128xi32>
    %162 = arith.subi %1, %161 : vector<24x128xi32>
    %163 = vector.broadcast %147 : i32 to vector<24x128xi32>
    %164 = arith.addi %162, %163 : vector<24x128xi32>
    %165 = arith.cmpi eq, %0, %164 : vector<24x128xi32>
    %166 = arith.andi %160, %165 : vector<24x128xi1>
    %167 = arith.extui %166 : vector<24x128xi1> to vector<24x128xi32>
    %168 = arith.sitofp %167 : vector<24x128xi32> to vector<24x128xf32>
    %cst_52 = arith.constant dense<0.000000e+00> : vector<64x128xf32>
    %169 = tpu.matmul %155, %168, %cst_52 {dimension_numbers = #tpu.dot_dimension_numbers<[1], [0], [0], [1], [0, 0, 1, 1], [], []>} : vector<64x24xf32>, vector<24x128xf32>, vector<64x128xf32> -> vector<64x128xf32>
    %170 = arith.addf %142, %169 : vector<64x128xf32>
    %c8_i32_53 = arith.constant 8 : i32
    %171 = arith.muli %arg0, %c8_i32_53 : i32
    %c6_i32 = arith.constant 6 : i32
    %172 = arith.addi %171, %c6_i32 : i32
    %c2_i32_54 = arith.constant 2 : i32
    %173 = arith.muli %c2_i32_54, %172 : i32
    %174 = arith.index_cast %173 : i32 to index
    %175 = memref.load %arg1[%174] : memref<32xi32, #tpu.memory_space<smem>>
    %c2_i32_55 = arith.constant 2 : i32
    %176 = arith.muli %c2_i32_55, %172 : i32
    %c1_i32_56 = arith.constant 1 : i32
    %177 = arith.addi %176, %c1_i32_56 : i32
    %178 = arith.index_cast %177 : i32 to index
    %179 = memref.load %arg1[%178] : memref<32xi32, #tpu.memory_space<smem>>
    %c6 = arith.constant 6 : index
    %c0_57 = arith.constant 0 : index
    %180 = arith.index_cast %179 : i32 to index
    %c0_58 = arith.constant 0 : index
    %181 = vector.load %arg2[%c6, %c0_57, %180, %c0_58] : memref<8x4x24x24xf32, #tpu.memory_space<vmem>>, vector<1x4x16x24xf32>
    %182 = vector.shape_cast %181 : vector<1x4x16x24xf32> to vector<4x16x24xf32>
    %183 = vector.shape_cast %182 : vector<4x16x24xf32> to vector<64x24xf32>
    %c96_i32_59 = arith.constant 96 : i32
    %184 = vector.broadcast %c96_i32_59 : i32 to vector<24x128xi32>
    %185 = arith.cmpi sge, %1, %184 : vector<24x128xi32>
    %c112_i32 = arith.constant 112 : i32
    %186 = vector.broadcast %c112_i32 : i32 to vector<24x128xi32>
    %187 = arith.cmpi slt, %1, %186 : vector<24x128xi32>
    %188 = arith.andi %185, %187 : vector<24x128xi1>
    %c96_i32_60 = arith.constant 96 : i32
    %189 = vector.broadcast %c96_i32_60 : i32 to vector<24x128xi32>
    %190 = arith.subi %1, %189 : vector<24x128xi32>
    %191 = vector.broadcast %175 : i32 to vector<24x128xi32>
    %192 = arith.addi %190, %191 : vector<24x128xi32>
    %193 = arith.cmpi eq, %0, %192 : vector<24x128xi32>
    %194 = arith.andi %188, %193 : vector<24x128xi1>
    %195 = arith.extui %194 : vector<24x128xi1> to vector<24x128xi32>
    %196 = arith.sitofp %195 : vector<24x128xi32> to vector<24x128xf32>
    %cst_61 = arith.constant dense<0.000000e+00> : vector<64x128xf32>
    %197 = tpu.matmul %183, %196, %cst_61 {dimension_numbers = #tpu.dot_dimension_numbers<[1], [0], [0], [1], [0, 0, 1, 1], [], []>} : vector<64x24xf32>, vector<24x128xf32>, vector<64x128xf32> -> vector<64x128xf32>
    %198 = arith.addf %170, %197 : vector<64x128xf32>
    %c8_i32_62 = arith.constant 8 : i32
    %199 = arith.muli %arg0, %c8_i32_62 : i32
    %c7_i32 = arith.constant 7 : i32
    %200 = arith.addi %199, %c7_i32 : i32
    %c2_i32_63 = arith.constant 2 : i32
    %201 = arith.muli %c2_i32_63, %200 : i32
    %202 = arith.index_cast %201 : i32 to index
    %203 = memref.load %arg1[%202] : memref<32xi32, #tpu.memory_space<smem>>
    %c2_i32_64 = arith.constant 2 : i32
    %204 = arith.muli %c2_i32_64, %200 : i32
    %c1_i32_65 = arith.constant 1 : i32
    %205 = arith.addi %204, %c1_i32_65 : i32
    %206 = arith.index_cast %205 : i32 to index
    %207 = memref.load %arg1[%206] : memref<32xi32, #tpu.memory_space<smem>>
    %c7 = arith.constant 7 : index
    %c0_66 = arith.constant 0 : index
    %208 = arith.index_cast %207 : i32 to index
    %c0_67 = arith.constant 0 : index
    %209 = vector.load %arg2[%c7, %c0_66, %208, %c0_67] : memref<8x4x24x24xf32, #tpu.memory_space<vmem>>, vector<1x4x16x24xf32>
    %210 = vector.shape_cast %209 : vector<1x4x16x24xf32> to vector<4x16x24xf32>
    %211 = vector.shape_cast %210 : vector<4x16x24xf32> to vector<64x24xf32>
    %c112_i32_68 = arith.constant 112 : i32
    %212 = vector.broadcast %c112_i32_68 : i32 to vector<24x128xi32>
    %213 = arith.cmpi sge, %1, %212 : vector<24x128xi32>
    %c128_i32 = arith.constant 128 : i32
    %214 = vector.broadcast %c128_i32 : i32 to vector<24x128xi32>
    %215 = arith.cmpi slt, %1, %214 : vector<24x128xi32>
    %216 = arith.andi %213, %215 : vector<24x128xi1>
    %c112_i32_69 = arith.constant 112 : i32
    %217 = vector.broadcast %c112_i32_69 : i32 to vector<24x128xi32>
    %218 = arith.subi %1, %217 : vector<24x128xi32>
    %219 = vector.broadcast %203 : i32 to vector<24x128xi32>
    %220 = arith.addi %218, %219 : vector<24x128xi32>
    %221 = arith.cmpi eq, %0, %220 : vector<24x128xi32>
    %222 = arith.andi %216, %221 : vector<24x128xi1>
    %223 = arith.extui %222 : vector<24x128xi1> to vector<24x128xi32>
    %224 = arith.sitofp %223 : vector<24x128xi32> to vector<24x128xf32>
    %cst_70 = arith.constant dense<0.000000e+00> : vector<64x128xf32>
    %225 = tpu.matmul %211, %224, %cst_70 {dimension_numbers = #tpu.dot_dimension_numbers<[1], [0], [0], [1], [0, 0, 1, 1], [], []>} : vector<64x24xf32>, vector<24x128xf32>, vector<64x128xf32> -> vector<64x128xf32>
    %226 = arith.addf %198, %225 : vector<64x128xf32>
    %c0_71 = arith.constant 0 : index
    %c0_72 = arith.constant 0 : index
    %c0_73 = arith.constant 0 : index
    %227 = vector.load %arg3[%c0_71, %c0_72, %c0_73] : memref<1x64x128xf32, #tpu.memory_space<vmem>>, vector<1x64x128xf32>
    %228 = vector.shape_cast %227 : vector<1x64x128xf32> to vector<64x128xf32>
    %229 = vector.shape_cast %226 : vector<64x128xf32> to vector<1x64x128xf32>
    tpu.vector_store %arg3[%c0_71, %c0_72, %c0_73], %229 {strides = array<i32>} : memref<1x64x128xf32, #tpu.memory_space<vmem>>, vector<1x64x128xf32>,
    return
  }
  func.func @transform_0(%arg0: i32, %arg1: memref<32xi32, #tpu.memory_space<smem>>) -> (i32, i32, i32, i32) {
    %c0_i32 = arith.constant 0 : i32
    %c0_i32_0 = arith.constant 0 : i32
    %c0_i32_1 = arith.constant 0 : i32
    %c0_i32_2 = arith.constant 0 : i32
    return %arg0, %c0_i32, %c0_i32_0, %c0_i32_1 : i32, i32, i32, i32
  }
  func.func @transform_1(%arg0: i32, %arg1: memref<32xi32, #tpu.memory_space<smem>>) -> (i32, i32, i32) {
    %c0_i32 = arith.constant 0 : i32
    %c0_i32_0 = arith.constant 0 : i32
    %c0_i32_1 = arith.constant 0 : i32
    return %arg0, %c0_i32, %c0_i32_0 : i32, i32, i32
  }
}

</mosaic_0001>

<bundles_post_ra>
// kernel: tpu_custom_call.1
= control target key start
LH: loop header
LB: loop body
LE: loop exit
PB: predicated region body
PF: predicated region fallthrough
CT: control target
= control target key end

     0   :  { %s1483_s12 = smov [#allocation3]   ;;  %s2075_s0 = inlined_call_operand.hbm [shape: s32[32], index: 0, kind: input, shape index: {}]   ;;  %s2076_s1 = inlined_call_operand.hbm [shape: f32[16,4,24,24], index: 1, kind: input, shape index: {}]   ;;  %s2077_s2 = inlined_call_operand.hbm [shape: f32[2,64,128], index: 2, kind: output, shape index: {}]  }
   0x1   :  { %s8_s11 = sshll.u32 %s2075_s0, 4  ;;  %s9_s11 = int_to_ptr.hbm [resolvable:$true] %s8_s11 }
   0x2   :  { %11 = dma.hbm_to_smem %s9_s11, 16, %s1483_s12, [#allocation2] }
   0x3   :  { %1457 = dma.done.wait [#allocation2], 16 }
   0x4   :  { %1458 = vsyncadd [#allocation2], 4294967280 }
   0x5   :  { %14 = sfence }
   0x6   :  { %15 = vsyncpa [#allocation5], 0 }
   0x7   :  { %17 = vsyncpa [#allocation5 + $0x1], 0 }
   0x8   :  { %18 = vsyncpa [#allocation6], 0 }
   0x9   :  { %20 = vsyncpa [#allocation6 + $0x1], 0  ;;  %s1507_s13 = smov 0   ;;  %s1509_s14 = smov 0  }
   0xa   :  { %s1511_s15 = smov 0   ;;  %s1513_s16 = smov 0  }
   0xb LB: > { %s1528_s0 = sadd.s32 4294967295, %s1481_s16   ;;  %s1097_s17 = sadd.s32 4294967294, %s1481_s16   ;;  %s1481_s16 = sphi %s1513_s16, %s2100_s16   ;;  %s1477_s15 = sphi %s1511_s15, %s2099_s15   ;;  %s1473_s14 = sphi %s1509_s14, %s2098_s14   ;;  %s1469_s13 = sphi %s1507_s13, %s2097_s13  }
   0xc   : > { %s1532_s18 = sadd.s32 1, %s1481_s16   ;;  %s33_s19 = sadd.s32 1, %s1477_s15 }
   0xd   : > { %s30_s20 = ssub.s32 %s1481_s16, %s1532_s18  ;;  %p40_p0 = scmp.ne.s32.totalorder %s1477_s15, %s1473_s14 }
   0xe   : > { %p31_p1 = scmp.eq.s32.totalorder %s30_s20, 0  ;;  %p41_p2 = scmp.eq.s32.totalorder %s1481_s16, 0 }
   0xf   : > { %p46_p3 = scmp.ne.s32.totalorder %s1473_s14, %s1469_s13  ;;  %p47_p4 = scmp.eq.s32.totalorder %s1528_s0, 0 }
  0x10   : > { %s1544_s21 = scalar_select %p31_p1, %s1477_s15, %s33_s19  }
  0x11   : > { %p42_p5 = por %p41_p2, %p40_p0  ;;  %p1546_p6 = por %p47_p4, %p46_p3 }
  0x12   : > { %p70_p7 = scmp.eq.s32.totalorder %s1528_s0, 1  ;;  %p76_p8 = scmp.eq.s32.totalorder %s1097_s17, 1 }
  0x13   : > { %p1099_p9 = scmp.ge.s32.totalorder %s1481_s16, 2  ;;  %p1331_p10 = scmp.lt.s32.totalorder %s1481_s16, 2 }
  0x14   : > { %p1553_p11 = por %p70_p7, %p40_p0  ;;  %p1557_p12 = por %p76_p8, %p46_p3 }
  0x15   : > { %s96_s25 = sand.u32 1, %s1477_s15   ;;  %s1317_s26 = smul.u32 768, %s1481_s16 }
  0x16   : > { %s1316_s27 = smul.u32 768, %s96_s25  ;;  %p1566_p13 = pnand %p1331_p10, %p42_p5 }
  0x17   : > { %s106_s30 = scalar_lea.hbm %s2076_s1, %s1317_s26  ;;  %s97_s7 = scalar_lea.sflag [#allocation5], %s96_s25 }
  0x18   : > { %s107_s4 = sshll.u32 %s106_s30, 4  ;;  %s100_s5 = scalar_lea.vmem [#allocation4], %s1316_s27  ;;  %s108_s4 = int_to_ptr.hbm [resolvable:$true] %s107_s4 }
  0x19   : > { %s109_s6 = sshll.u32 %s100_s5, 4  ;;  %s1383_s8 = sshra.s32 %s108_s4, 4  ;;  %s110_s6 = int_to_ptr.vmem [resolvable:$true] %s109_s6  ;;  %s1384_s8 = int_to_ptr.hbm [resolvable:$true] %s1383_s8 }
  0x1a   : > { %s1385_s9 = scalar_lea.hbm %s1384_s8, 768  ;;  %p1387_p1 = pneg %p1566_p13 }
  0x1b   : > { %p1386_p0 = scmp.ne.s32.totalorder %s1384_s8, %s1385_s9  ;;  %s1390_s12 = scalar_lea.hbm %s2076_s1, 1536 }
  0x1c   : > { %p1391_p4 = scmp.lt.s32.totalorder %s1384_s8, %s2076_s1  ;;  %p1392_p5 = scmp.lt.s32.totalorder %s1390_s12, %s1385_s9 }
  0x1d   : > { %p1388_p2 = pnand %p1387_p1, %p1386_p0 }
  0x1e   : > { %p1393_p7 = por %p1392_p5, %p1391_p4 }
  0x1f   : > { %p1389_p3 = pneg %p1388_p2 }
  0x21   : > { %p1394_p8 = pnand %p1393_p7, %p1389_p3 }
  0x23   : > { %1397 = shalt.err (!%p1394_p8)
}
  0x24   : > { %s1484_s20 = smov 128   ;;  %s1485_s25 = smov 8  }
  0x25   : > { %1326 = dma.hbm_to_vmem [thread:$0]  (!%p1566_p13), %s108_s4, 12288, %s110_s6, %s97_s7, %s1484_s20, %s1484_s20, %s1485_s25  }
  0x26   : > { %p1103_p10 = scmp.ge.s32.totalorder %s1481_s16, 1  ;;  %p117_p0 = scmp.lt.s32.totalorder %s1481_s16, 3 }
  0x28   : > { %p118_p1 = pnand %p1103_p10, %p117_p0 }
  0x29   : > { %s1583_s26 = sand.u32 (!%p118_p1), 1, %s1473_s14  }
  0x2a   : > { %121 = sbr.rel (%p118_p1) target bundleno = 335 (0x14f), region = 24  ;;  %s124_s28 = scalar_lea.sflag (!%p118_p1), [#allocation5], %s1583_s26 }
  0x2b   : > { %s1318_s27 = smul.u32 (!%p118_p1), 768, %s1583_s26 }
  0x2d   : > { %s1587_s29 = scalar_lea.vmem (!%p118_p1), [#allocation4], %s1318_s27 }
  0x2f   : > { %1460 = dma.done.wait (%p1546_p6), %s124_s28, 12288  }
  0x30   : > { %1462 = vsyncadd (%p1546_p6), %s124_s28, 4294955008  ;;  %v148_v0 = vlaneseq  ;;  %s1594_s30 = sshll.u32 %s1528_s0, 4  ;;  %v1486_v18 = vmov 1.0  }
  0x31   : > { %s1295_s3 = sadd.s32 2, %s1594_s30  ;;  %s1297_s4 = sadd.s32 4, %s1594_s30 }
  0x32   : > { %v1598_v1 = vshrl.u32 %v148_v0, 7  ;;  %v1600_v2 = vand.u32 127, %v148_v0  ;;  %s187_s5 = sld [smem:[#allocation3 + %s1295_s3]]  ;;  %s188_s6 = sadd.s32 1, %s1295_s3 }
  0x33   : > { %s1602_s7 = sld [smem:[#allocation3 + %s1297_s4]]  ;;  %s1299_s22 = sadd.s32 6, %s1594_s30 }
  0x34   : > { %s1605_s8 = sld [smem:[#allocation3 + %s188_s6]]  ;;  %vm200_vm0 = vcmp.ge.s32.totalorder %v1600_v2, 16  ;;  %vm201_vm1 = vcmp.lt.s32.totalorder %v1600_v2, 32  ;;  %v1119_v3 = vadd.s32 4294967280, %v1600_v2  ;;  %s352_s9 = sadd.s32 1, %s1297_s4  ;;  %v1611_v4 = vadd.s32 16, %v1598_v1 }
  0x35   : > { %vm364_vm2 = vcmp.ge.s32.totalorder %v1600_v2, 32  ;;  %vm365_vm3 = vcmp.lt.s32.totalorder %v1600_v2, 48  ;;  %s1616_s10 = sld [smem:[#allocation3 + %s1594_s30]]  ;;  %s1305_s11 = sadd.s32 12, %s1594_s30  ;;  %v1154_v5 = vadd.s32 4294967264, %v1600_v2  ;;  %v1621_v6 = vadd.s32 8, %v1598_v1  ;;  %vm1629_vm6 = vmand %vm200_vm0, %vm201_vm1 }
  0x36   : > { %s1623_s12 = sld [smem:[#allocation3 + %s1299_s22]]  ;;  %s458_s17 = sadd.s32 1, %s1299_s22  ;;  %vm470_vm4 = vcmp.ge.s32.totalorder %v1600_v2, 48  ;;  %vm471_vm5 = vcmp.lt.s32.totalorder %v1600_v2, 64  ;;  %vm788_vm7 = vcmp.ge.s32.totalorder %v1600_v2, 96  ;;  %vm789_vm8 = vcmp.lt.s32.totalorder %v1600_v2, 112  ;;  %vm1642_vm9 = vmand %vm364_vm2, %vm365_vm3 }
  0x37   : > { %s1633_s19 = sld [smem:[#allocation3 + %s352_s9]]  ;;  %s156_s20 = sadd.s32 1, %s1594_s30  ;;  %vm2078_vm10 = vcmp.lt.s32.totalorder %v1600_v2, 16  ;;  %vm1654_vm11 = vmand %vm470_vm4, %vm471_vm5  ;;  %v1178_v13 = vadd.s32 4294967248, %v1600_v2  ;;  %vm576_vm12 = vcmp.ge.s32.totalorder %v1600_v2, 64  ;;  %vm577_vm0 = vcmp.lt.s32.totalorder %v1600_v2, 80 }
  0x38   : > { %v204_v8 = vstv %s187_s5  ;;  %s1648_s25 = sld [smem:[#allocation3 + %s1305_s11]]  ;;  %s1301_s28 = sadd.s32 8, %s1594_s30  ;;  %vm1667_vm15 = vmand %vm788_vm7, %vm789_vm8  ;;  %v1250_v17 = vadd.s32 4294967200, %v1600_v2  ;;  %vm682_vm2 = vcmp.ge.s32.totalorder %v1600_v2, 80  ;;  %vm683_vm3 = vcmp.lt.s32.totalorder %v1600_v2, 96 }
  0x39   : > { %v205_v9 = vadd.s32 %v1119_v3, %v204_v8  ;;  %v368_v11 = vstv %s1602_s7  ;;  %s1652_s27 = sld [smem:[#allocation3 + %s458_s17]]  ;;  %s1307_s5 = sadd.s32 14, %s1594_s30  ;;  %v1202_v24 = vadd.s32 4294967232, %v1600_v2  ;;  %v1274_v28 = vadd.s32 4294967184, %v1600_v2 }
  0x3a   : > { %v369_v14 = vadd.s32 %v1154_v5, %v368_v11  ;;  %s1671_s3 = sld [smem:[#allocation3 + %s156_s20]]  ;;  %s1694_s6 = scalar_lea.vmem %s1587_s29, %s1605_s8 [#allocation4]  ;;  %v1226_v33 = vadd.s32 4294967216, %v1600_v2 }
  0x3b   : > { %vm208_vm13 = vcmp.eq.s32.totalorder %v1611_v4, %v205_v9  ;;  %vm207_vm14 = vcmp.eq.s32.totalorder %v1621_v6, %v205_v9  ;;  %v170_v16 = vstv %s1616_s10  ;;  %s1680_s4 = sld [smem:[#allocation3 + %s1301_s28]]  ;;  %s1303_s22 = sadd.s32 10, %s1594_s30  ;;  %v1111_v27 = vld [vmem:[%s1694_s6 + $0x60] sm:$0xff]  ;;  %v1112_v39 = vld [vmem:[%s1694_s6 + $0x68] sm:$0xff]  ;;  %v1113_v43 = vld [vmem:[%s1694_s6 + $0x78] sm:$0xff] }
  0x3c   : > { %vm211_vm1 = vmand %vm1629_vm6, %vm208_vm13  ;;  %vm372_vm4 = vcmp.eq.s32.totalorder %v1611_v4, %v369_v14  ;;  %v171_v19 = vadd.s32 %v170_v16, %v1600_v2  ;;  %vm371_vm7 = vcmp.eq.s32.totalorder %v1621_v6, %v369_v14  ;;  %v474_v20 = vstv %s1623_s12  ;;  %s1708_s7 = sld [smem:[#allocation3 + %s1307_s5]]  ;;  %v1114_v47 = vld [vmem:[%s1694_s6 + $0x80] sm:$0xff]  ;;  %v1115_v51 = vld [vmem:[%s1694_s6 + $0x90] sm:$0xff]  ;;  %s564_s17 = sadd.s32 1, %s1301_s28 }
  0x3d   : > { %1123 = vmatpush.msk.msra.mxu0 %vm211_vm1, %v1486_v18  ;;  %vm210_vm5 = vmand %vm1629_vm6, %vm207_vm14  ;;  %v475_v21 = vadd.s32 %v1178_v13, %v474_v20  ;;  %s1721_s8 = scalar_lea.vmem %s1587_s29, %s1633_s19 [#allocation4]  ;;  %s1746_s9 = sld [smem:[#allocation3 + %s1303_s22]]  ;;  %v1116_v55 = vld [vmem:[%s1694_s6 + $0x98] sm:$0xff]  ;;  %v1117_v59 = vld [vmem:[%s1694_s6 + $0xa8] sm:$0xff] }
  0x3e   : > { %vm375_vm8 = vmand %vm1642_vm9, %vm372_vm4  ;;  %vm174_vm14 = vcmp.eq.s32.totalorder %v1611_v4, %v171_v19  ;;  %vm206_vm4 = vcmp.eq.s32.totalorder %v1598_v1, %v205_v9  ;;  %v792_v23 = vstv %s1648_s25  ;;  %v1146_v30 = vld [vmem:[%s1721_s8 + $0xc0] sm:$0xff]  ;;  %v1147_v40 = vld [vmem:[%s1721_s8 + $0xc8] sm:$0xff]  ;;  %s776_s19 = sadd.s32 1, %s1305_s11  ;;  %s565_s20 = sld [smem:[#allocation3 + %s564_s17]] }
  0x3f   : > { %vm1702_vm13 = vmand %vm576_vm12, %vm577_vm0  ;;  %1158 = vmatpush.msk.msra.mxu2 %vm375_vm8, %v1486_v18  ;;  %1124 = vmatpush.msk.msra.mxu0 %vm210_vm5, %v1486_v18  ;;  %vm478_vm0 = vcmp.eq.s32.totalorder %v1611_v4, %v475_v21  ;;  %vm173_vm5 = vcmp.eq.s32.totalorder %v1621_v6, %v171_v19  ;;  %v1727_v25 = vadd.s32 %v1250_v17, %v792_v23  ;;  %s1771_s12 = scalar_lea.vmem %s1587_s29, %s1652_s27 [#allocation4]  ;;  %v1148_v44 = vld [vmem:[%s1721_s8 + $0xd8] sm:$0xff]  ;;  %v1149_v48 = vld [vmem:[%s1721_s8 + $0xe0] sm:$0xff]  ;;  %s777_s25 = sld [smem:[#allocation3 + %s776_s19]] }
  0x40   : > { %vm374_vm1 = vmand %vm1642_vm9, %vm371_vm7  ;;  %s1765_s10 = scalar_lea.vmem %s1587_s29, %s1671_s3 [#allocation4]  ;;  %v1170_v36 = vld [vmem:[%s1771_s12 + $0x120] sm:$0xff]  ;;  %v1171_v42 = vld [vmem:[%s1771_s12 + $0x128] sm:$0xff]  ;;  %s670_s27 = sadd.s32 1, %s1303_s22 }
  0x41   : > { %vm177_vm12 = vmand %vm2078_vm10, %vm174_vm14  ;;  %1159 = vmatpush.msk.msra.mxu2 %vm374_vm1, %v1486_v18  ;;  %vm370_vm14 = vcmp.eq.s32.totalorder %v1598_v1, %v369_v14  ;;  %vm218_vm10 = vcmask 195584   ;;  %v580_v29 = vstv %s1680_s4  ;;  %vm2095_vm1 = vcmp.lt.s32.totalorder %v1600_v2, 16  ;;  %v159_v35 = vld [vmem:[%s1765_s10] sm:$0xff]  ;;  %v160_v41 = vld [vmem:[%s1765_s10 + $0x8] sm:$0xff]  ;;  %s882_s3 = sadd.s32 1, %s1307_s5  ;;  %s671_s11 = sld [smem:[#allocation3 + %s670_s27]] }
  0x42   : > { %vm1733_vm7 = vmand %vm682_vm2, %vm683_vm3  ;;  %1134 = vmatpush.msk.msra.mxu1 %vm177_vm12, %v1486_v18  ;;  %vm477_vm3 = vcmp.eq.s32.totalorder %v1621_v6, %v475_v21  ;;  %v1767_v31 = vadd.s32 %v1202_v24, %v580_v29  ;;  %v898_v32 = vstv %s1708_s7  ;;  %v161_v45 = vld [vmem:[%s1765_s10 + $0x18] sm:$0xff]  ;;  %v162_v49 = vld [vmem:[%s1765_s10 + $0x20] sm:$0xff]  ;;  %s883_s28 = sld [smem:[#allocation3 + %s882_s3]]  ;;  %s1308_s22 = sshll.u32 %s1528_s0, 6 }
  0x43   : > { %vm481_vm8 = vmand %vm1654_vm11, %vm478_vm0  ;;  %vm796_vm0 = vcmp.eq.s32.totalorder %v1611_v4, %v1727_v25  ;;  %v899_v34 = vadd.s32 %v1274_v28, %v898_v32  ;;  %v686_v37 = vstv %s1746_s9  ;;  %v1172_v46 = vld [vmem:[%s1771_s12 + $0x138] sm:$0xff]  ;;  %v1173_v50 = vld [vmem:[%s1771_s12 + $0x140] sm:$0xff]  ;;  %s994_s0 = scalar_lea.sflag [#allocation6], %s1583_s26  ;;  %s1433_s3 = scalar_lea.hbm %s2077_s2, 128 }
  0x44   : > { %1182 = vmatpush.msk.msra.mxu3 %vm481_vm8, %v1486_v18  ;;  %vm209_vm2 = vmand %vm1629_vm6, %vm206_vm4  ;;  %vm172_vm4 = vcmp.eq.s32.totalorder %v1598_v1, %v171_v19  ;;  %vm476_vm8 = vcmp.eq.s32.totalorder %v1598_v1, %v475_v21  ;;  %v687_v38 = vadd.s32 %v1226_v33, %v686_v37  ;;  %v1150_v52 = vld [vmem:[%s1721_s8 + $0xf0] sm:$0xff]  ;;  %v1151_v56 = vld [vmem:[%s1721_s8 + $0xf8] sm:$0xff]  ;;  %s1917_s4 = scalar_lea.vmem %s1587_s29, %s565_s20 [#allocation4] }
  0x45   : > { %1125 = vmatpush.msk.msra.mxu0 %vm209_vm2, %v1486_v18  ;;  %vm176_vm12 = vmand %vm2095_vm1, %vm173_vm5  ;;  %v163_v53 = vld [vmem:[%s1765_s10 + $0x30] sm:$0xff]  ;;  %v164_v57 = vld [vmem:[%s1765_s10 + $0x38] sm:$0xff]  ;;  %s1923_s30 = scalar_lea.vmem %s1587_s29, %s777_s25 [#allocation4] }
  0x46   : > { %1135 = vmatpush.msk.msra.mxu1 %vm176_vm12, %v1486_v18  ;;  %vm373_vm6 = vmand %vm1642_vm9, %vm370_vm14  ;;  %1126 = vmatmul.msk.f32.vlgmr.msra.gmra.mxu0 %vm218_vm10, %v1111_v27  ;;  %vm584_vm14 = vcmp.eq.s32.totalorder %v1611_v4, %v1767_v31  ;;  %vm902_vm12 = vcmp.eq.s32.totalorder %v1611_v4, %v899_v34  ;;  %v1174_v54 = vld [vmem:[%s1771_s12 + $0x150] sm:$0xff]  ;;  %v1175_v58 = vld [vmem:[%s1771_s12 + $0x158] sm:$0xff] }
  0x47   : > { %1160 = vmatpush.msk.msra.mxu2 %vm373_vm6, %v1486_v18  ;;  %vm480_vm5 = vmand %vm1654_vm11, %vm477_vm3  ;;  %v1152_v60 = vld [vmem:[%s1721_s8 + $0x108] sm:$0xff]  ;;  %v1118_v63 = vld [vmem:[%s1694_s6 + $0xb0] sm:$0xff]  ;;  %s1929_s5 = scalar_lea.vmem %s1587_s29, %s671_s11 [#allocation4] }
  0x48   : > { %1183 = vmatpush.msk.msra.mxu3 %vm480_vm5, %v1486_v18  ;;  %1161 = vmatmul.msk.f32.vlgmr.msra.gmra.mxu2 %vm218_vm10, %v1146_v30  ;;  %vm799_vm9 = vmand %vm1667_vm15, %vm796_vm0  ;;  %vm690_vm5 = vcmp.eq.s32.totalorder %v1611_v4, %v687_v38  ;;  %v165_v61 = vld [vmem:[%s1765_s10 + $0x48] sm:$0xff]  ;;  %v1153_v0 = vld [vmem:[%s1721_s8 + $0x110] sm:$0xff]  ;;  %s1933_s6 = scalar_lea.vmem %s1587_s29, %s883_s28 [#allocation4]  ;;  %s1104_s29 = sshll.u32 %s1583_s26, 6 }
  0x49   : > { %1254 = vmatpush.msk.msrb.mxu2 %vm799_vm9, %v1486_v18  ;;  %vm2096_vm2 = vmmov %vm2095_vm1  ;;  %vm894_vm1 = vcmp.ge.s32.totalorder %v1600_v2, 112  ;;  %v1176_v62 = vld [vmem:[%s1771_s12 + $0x168] sm:$0xff]  ;;  %v1177_v2 = vld [vmem:[%s1771_s12 + $0x170] sm:$0xff]  ;;  %s2020_s7 = scalar_lea.vmem [#allocation7], %s1104_s29 }
  0x4a   : > { %vm175_vm3 = vmand %vm2096_vm2, %vm172_vm4  ;;  %vm795_vm4 = vcmp.eq.s32.totalorder %v1621_v6, %v1727_v25  ;;  %v1194_v3 = vld [vmem:[%s1917_s4 + $0x180] sm:$0xff]  ;;  %v1195_v7 = vld [vmem:[%s1917_s4 + $0x188] sm:$0xff]  ;;  %s1006_s12 = sshll.u32 %s2020_s7, 4  ;;  %s1007_s12 = int_to_ptr.vmem [resolvable:$true] %s1006_s12 }
  0x4b   : > { %1136 = vmatpush.msk.msra.mxu1 %vm175_vm3, %v1486_v18  ;;  %vm479_vm0 = vmand %vm1654_vm11, %vm476_vm8  ;;  %vm583_vm8 = vcmp.eq.s32.totalorder %v1621_v6, %v1767_v31  ;;  %vm689_vm3 = vcmp.eq.s32.totalorder %v1621_v6, %v687_v38  ;;  %v1242_v4 = vld [vmem:[%s1923_s30 + $0x240] sm:$0xff]  ;;  %v1243_v8 = vld [vmem:[%s1923_s30 + $0x248] sm:$0xff] }
  0x4c   : > { %1184 = vmatpush.msk.msra.mxu3 %vm479_vm0, %v1486_v18  ;;  %1137 = vmatmul.msk.f32.vlgmr.msra.gmra.mxu1 %vm218_vm10, %v159_v35  ;;  %vm587_vm6 = vmand %vm1702_vm13, %vm584_vm14  ;;  %vm901_vm14 = vcmp.eq.s32.totalorder %v1621_v6, %v899_v34  ;;  %v1218_v5 = vld [vmem:[%s1929_s5 + $0x1e0] sm:$0xff]  ;;  %v1219_v9 = vld [vmem:[%s1929_s5 + $0x1e8] sm:$0xff] }
  0x4d   : > { %1185 = vmatmul.msk.f32.vlgmr.msra.gmra.mxu3 %vm218_vm10, %v1170_v36  ;;  %1206 = vmatpush.msk.msrb.mxu0 %vm587_vm6, %v1486_v18  ;;  %vm905_vm11 = vmand %vm894_vm1, %vm902_vm12  ;;  %v1266_v6 = vld [vmem:[%s1933_s6 + $0x2a0] sm:$0xff]  ;;  %v1267_v10 = vld [vmem:[%s1933_s6 + $0x2a8] sm:$0xff] }
  0x4e   : > { %1278 = vmatpush.msk.msrb.mxu3 %vm905_vm11, %v1486_v18  ;;  %vm693_vm9 = vmand %vm1733_vm7, %vm690_vm5  ;;  %1127 = vmatmul.msk.f32.gmra.mxu0 %vm218_vm10, %v1112_v39  ;;  %vm582_vm11 = vcmp.eq.s32.totalorder %v1598_v1, %v1767_v31  ;;  %vm900_vm5 = vcmp.eq.s32.totalorder %v1598_v1, %v899_v34  ;;  %v1196_v11 = vld [vmem:[%s1917_s4 + $0x198] sm:$0xff]  ;;  %v1197_v15 = vld [vmem:[%s1917_s4 + $0x1a0] sm:$0xff] }
  0x4f   : > { %1230 = vmatpush.msk.msrb.mxu1 %vm693_vm9, %v1486_v18  ;;  %vm798_vm2 = vmand %vm1667_vm15, %vm795_vm4  ;;  %vm794_vm4 = vcmp.eq.s32.totalorder %v1598_v1, %v1727_v25  ;;  %vm688_vm9 = vcmp.eq.s32.totalorder %v1598_v1, %v687_v38  ;;  %v166_v1 = vld [vmem:[%s1765_s10 + $0x50] sm:$0xff]  ;;  %v1244_v12 = vld [vmem:[%s1923_s30 + $0x258] sm:$0xff]  ;;  %s1005_s10 = scalar_lea.hbm %s2077_s2, %s1308_s22 }
  0x50   : > { %1255 = vmatpush.msk.msrb.mxu2 %vm798_vm2, %v1486_v18  ;;  %vm586_vm12 = vmand %vm1702_vm13, %vm583_vm8  ;;  %v1220_v13 = vld [vmem:[%s1929_s5 + $0x1f8] sm:$0xff]  ;;  %v1245_v16 = vld [vmem:[%s1923_s30 + $0x260] sm:$0xff]  ;;  %s1008_s17 = sshll.u32 %s1005_s10, 4  ;;  %s1009_s17 = int_to_ptr.hbm [resolvable:$true] %s1008_s17 }
  0x51   : > { %1162 = vmatmul.msk.f32.gmra.mxu2 %vm218_vm10, %v1147_v40  ;;  %1207 = vmatpush.msk.msrb.mxu0 %vm586_vm12, %v1486_v18  ;;  %vm904_vm0 = vmand %vm894_vm1, %vm901_vm14  ;;  %v1268_v14 = vld [vmem:[%s1933_s6 + $0x2b8] sm:$0xff]  ;;  %v1221_v17 = vld [vmem:[%s1929_s5 + $0x200] sm:$0xff]  ;;  %s1427_s19 = sshra.s32 %s1009_s17, 4  ;;  %s1428_s19 = int_to_ptr.hbm [resolvable:$true] %s1427_s19 }
  0x52   : > { %1279 = vmatpush.msk.msrb.mxu3 %vm904_vm0, %v1486_v18  ;;  %vm692_vm6 = vmand %vm1733_vm7, %vm689_vm3  ;;  %v1198_v19 = vld [vmem:[%s1917_s4 + $0x1b0] sm:$0xff]  ;;  %v1199_v23 = vld [vmem:[%s1917_s4 + $0x1b8] sm:$0xff]  ;;  %s1429_s20 = scalar_lea.hbm %s1428_s19, 64  ;;  %p1434_p3 = scmp.lt.s32.totalorder %s1428_s19, %s2077_s2 }
  0x53   : > { %1231 = vmatpush.msk.msrb.mxu1 %vm692_vm6, %v1486_v18  ;;  %vm797_vm8 = vmand %vm1667_vm15, %vm794_vm4  ;;  %v1246_v20 = vld [vmem:[%s1923_s30 + $0x270] sm:$0xff]  ;;  %v1247_v24 = vld [vmem:[%s1923_s30 + $0x278] sm:$0xff]  ;;  %p1430_p6 = scmp.ne.s32.totalorder %s1428_s19, %s1429_s20  ;;  %p1435_p4 = scmp.lt.s32.totalorder %s1433_s3, %s1429_s20 }
  0x54   : > { %1138 = vmatmul.msk.f32.gmra.mxu1 %vm218_vm10, %v160_v41  ;;  %1256 = vmatpush.msk.msrb.mxu2 %vm797_vm8, %v1486_v18  ;;  %vm585_vm14 = vmand %vm1702_vm13, %vm582_vm11  ;;  %v1222_v21 = vld [vmem:[%s1929_s5 + $0x210] sm:$0xff]  ;;  %v1223_v25 = vld [vmem:[%s1929_s5 + $0x218] sm:$0xff] }
  0x55   : > { %1186 = vmatmul.msk.f32.gmra.mxu3 %vm218_vm10, %v1171_v42  ;;  %1208 = vmatpush.msk.msrb.mxu0 %vm585_vm14, %v1486_v18  ;;  %vm903_vm2 = vmand %vm894_vm1, %vm900_vm5  ;;  %v1270_v22 = vld [vmem:[%s1933_s6 + $0x2d0] sm:$0xff]  ;;  %v1271_v26 = vld [vmem:[%s1933_s6 + $0x2d8] sm:$0xff]  ;;  %p1431_p13 = pnand %p1430_p6, %p1553_p11  ;;  %p1436_p5 = por %p1435_p4, %p1434_p3 }
  0x56   : > { %1128 = vmatmul.msk.f32.gmra.mxu0 %vm218_vm10, %v1113_v43  ;;  %1280 = vmatpush.msk.msrb.mxu3 %vm903_vm2, %v1486_v18  ;;  %vm691_vm15 = vmand %vm1733_vm7, %vm688_vm9  ;;  %v1200_v27 = vld [vmem:[%s1917_s4 + $0x1c8] sm:$0xff]  ;;  %v1201_v31 = vld [vmem:[%s1917_s4 + $0x1d0] sm:$0xff] }
  0x57   : > { %1232 = vmatpush.msk.msrb.mxu1 %vm691_vm15, %v1486_v18  ;;  %v1269_v18 = vld [vmem:[%s1933_s6 + $0x2c0] sm:$0xff]  ;;  %v1248_v28 = vld [vmem:[%s1923_s30 + $0x288] sm:$0xff]  ;;  %v1249_v32 = vld [vmem:[%s1923_s30 + $0x290] sm:$0xff]  ;;  %p1432_p2 = pneg %p1431_p13 }
  0x58   : > { %v1224_v29 = vld [vmem:[%s1929_s5 + $0x228] sm:$0xff]  ;;  %v1225_v33 = vld [vmem:[%s1929_s5 + $0x230] sm:$0xff] }
  0x59   : > { %1163 = vmatmul.msk.f32.gmra.mxu2 %vm218_vm10, %v1148_v44  ;;  %v1272_v30 = vld [vmem:[%s1933_s6 + $0x2e8] sm:$0xff]  ;;  %v1273_v34 = vld [vmem:[%s1933_s6 + $0x2f0] sm:$0xff]  ;;  %p1437_p7 = pnand %p1436_p5, %p1432_p2 }
  0x5c   : > { %1139 = vmatmul.msk.f32.gmra.mxu1 %vm218_vm10, %v161_v45 }
  0x5d   : > { %1187 = vmatmul.msk.f32.gmra.mxu3 %vm218_vm10, %v1172_v46 }
  0x5e   : > { %1129 = vmatmul.msk.f32.gmra.mxu0 %vm218_vm10, %v1114_v47 }
  0x61   : > { %1164 = vmatmul.msk.f32.gmra.mxu2 %vm218_vm10, %v1149_v48 }
  0x64   : > { %1140 = vmatmul.msk.f32.gmra.mxu1 %vm218_vm10, %v162_v49 }
  0x65   : > { %1188 = vmatmul.msk.f32.gmra.mxu3 %vm218_vm10, %v1173_v50 }
  0x66   : > { %1130 = vmatmul.msk.f32.gmra.mxu0 %vm218_vm10, %v1115_v51 }
  0x69   : > { %1165 = vmatmul.msk.f32.gmra.mxu2 %vm218_vm10, %v1150_v52 }
  0x6c   : > { %1141 = vmatmul.msk.f32.gmra.mxu1 %vm218_vm10, %v163_v53 }
  0x6d   : > { %1189 = vmatmul.msk.f32.gmra.mxu3 %vm218_vm10, %v1174_v54 }
  0x6e   : > { %1131 = vmatmul.msk.f32.gmra.mxu0 %vm218_vm10, %v1116_v55 }
  0x71   : > { %1166 = vmatmul.msk.f32.gmra.mxu2 %vm218_vm10, %v1151_v56 }
  0x74   : > { %1142 = vmatmul.msk.f32.gmra.mxu1 %vm218_vm10, %v164_v57 }
  0x75   : > { %1190 = vmatmul.msk.f32.gmra.mxu3 %vm218_vm10, %v1175_v58 }
  0x76   : > { %1132 = vmatmul.msk.f32.gmra.mxu0 %vm218_vm10, %v1117_v59 }
  0x79   : > { %1167 = vmatmul.msk.f32.gmra.mxu2 %vm218_vm10, %v1152_v60 }
  0x7c   : > { %1143 = vmatmul.msk.f32.gmra.mxu1 %vm218_vm10, %v165_v61 }
  0x7d   : > { %1191 = vmatmul.msk.f32.gmra.mxu3 %vm218_vm10, %v1176_v62 }
  0x7e   : > { %1133 = vmatmul.msk.f32.gmra.mxu0 %vm218_vm10, %v1118_v63 }
  0x81   : > { %1168 = vmatmul.msk.f32.gmra.mxu2 %vm218_vm10, %v1153_v0 }
  0x84   : > { %1144 = vmatmul.msk.f32.gmra.mxu1 %vm218_vm10, %v166_v1 }
  0x85   : > { %1192 = vmatmul.msk.f32.gmra.mxu3 %vm218_vm10, %v1177_v2 }
  0x86   : > { %1209 = vmatmul.msk.f32.vlgmr.msrb.gmra.mxu0 %vm218_vm10, %v1194_v3 }
  0x89   : > { %1257 = vmatmul.msk.f32.vlgmr.msrb.gmra.mxu2 %vm218_vm10, %v1242_v4 }
  0x8c   : > { %1233 = vmatmul.msk.f32.vlgmr.msrb.gmra.mxu1 %vm218_vm10, %v1218_v5 }
  0x8d   : > { %1281 = vmatmul.msk.f32.vlgmr.msrb.gmra.mxu3 %vm218_vm10, %v1266_v6 }
  0x8e   : > { %1210 = vmatmul.msk.f32.gmra.mxu0 %vm218_vm10, %v1195_v7 }
  0x91   : > { %1258 = vmatmul.msk.f32.gmra.mxu2 %vm218_vm10, %v1243_v8 }
  0x94   : > { %1234 = vmatmul.msk.f32.gmra.mxu1 %vm218_vm10, %v1219_v9 }
  0x95   : > { %1282 = vmatmul.msk.f32.gmra.mxu3 %vm218_vm10, %v1267_v10 }
  0x96   : > { %1211 = vmatmul.msk.f32.gmra.mxu0 %vm218_vm10, %v1196_v11 }
  0x99   : > { %1259 = vmatmul.msk.f32.gmra.mxu2 %vm218_vm10, %v1244_v12 }
  0x9c   : > { %1235 = vmatmul.msk.f32.gmra.mxu1 %vm218_vm10, %v1220_v13 }
  0x9d   : > { %1283 = vmatmul.msk.f32.gmra.mxu3 %vm218_vm10, %v1268_v14 }
  0x9e   : > { %1212 = vmatmul.msk.f32.gmra.mxu0 %vm218_vm10, %v1197_v15 }
  0xa1   : > { %1260 = vmatmul.msk.f32.gmra.mxu2 %vm218_vm10, %v1245_v16 }
  0xa4   : > { %1236 = vmatmul.msk.f32.gmra.mxu1 %vm218_vm10, %v1221_v17 }
  0xa5   : > { %1284 = vmatmul.msk.f32.gmra.mxu3 %vm218_vm10, %v1269_v18 }
  0xa6   : > { %1213 = vmatmul.msk.f32.gmra.mxu0 %vm218_vm10, %v1198_v19 }
  0xa9   : > { %1261 = vmatmul.msk.f32.gmra.mxu2 %vm218_vm10, %v1246_v20 }
  0xac   : > { %1237 = vmatmul.msk.f32.gmra.mxu1 %vm218_vm10, %v1222_v21 }
  0xad   : > { %1285 = vmatmul.msk.f32.gmra.mxu3 %vm218_vm10, %v1270_v22 }
  0xae   : > { %1214 = vmatmul.msk.f32.gmra.mxu0 %vm218_vm10, %v1199_v23 }
  0xb1   : > { %1262 = vmatmul.msk.f32.gmra.mxu2 %vm218_vm10, %v1247_v24 }
  0xb4   : > { %1238 = vmatmul.msk.f32.gmra.mxu1 %vm218_vm10, %v1223_v25 }
  0xb5   : > { %1286 = vmatmul.msk.f32.gmra.mxu3 %vm218_vm10, %v1271_v26 }
  0xb6   : > { %1215 = vmatmul.msk.f32.gmra.mxu0 %vm218_vm10, %v1200_v27 }
  0xb9   : > { %1263 = vmatmul.msk.f32.gmra.mxu2 %vm218_vm10, %v1248_v28 }
  0xbc   : > { %1239 = vmatmul.msk.f32.gmra.mxu1 %vm218_vm10, %v1224_v29 }
  0xbd   : > { %1287 = vmatmul.msk.f32.gmra.mxu3 %vm218_vm10, %v1272_v30 }
  0xbe   : > { %1216 = vmatmul.msk.f32.gmra.mxu0 %vm218_vm10, %v1201_v31 }
  0xc1   : > { %1264 = vmatmul.msk.f32.gmra.mxu2 %vm218_vm10, %v1249_v32 }
  0xc3   : > { %v260_v35 = vpop.f32.mrf.mxu0 }
  0xc4   : > { %1240 = vmatmul.msk.f32.gmra.mxu1 %vm218_vm10, %v1225_v33 }
  0xc5   : > { %1288 = vmatmul.msk.f32.gmra.mxu3 %vm218_vm10, %v1273_v34 }
  0xc9   : > { %v325_v36 = vpop.f32.mrf.mxu1 }
  0xca   : > { %v326_v63 = vadd.f32 %v325_v36, %v260_v35 }
  0xcb   : > { %v423_v37 = vpop.f32.mrf.mxu2  ;;  %v263_v38 = vpop.f32.mrf.mxu0 }
  0xcc   : > { %v447_v1 = vadd.f32 %v423_v37, %v326_v63 }
  0xd0   : > { %v529_v39 = vpop.f32.mrf.mxu3 }
  0xd1   : > { %v328_v40 = vpop.f32.mrf.mxu1  ;;  %v553_v5 = vadd.f32 %v529_v39, %v447_v1 }
  0xd2   : > { %v329_v6 = vadd.f32 %v328_v40, %v263_v38 }
  0xd3   : > { %v266_v42 = vpop.f32.mrf.mxu0 }
  0xd4   : > { %v426_v41 = vpop.f32.mrf.mxu2 }
  0xd5   : > { %v448_v9 = vadd.f32 %v426_v41, %v329_v6 }
  0xd8   : > { %v532_v43 = vpop.f32.mrf.mxu3 }
  0xd9   : > { %v331_v44 = vpop.f32.mrf.mxu1  ;;  %v554_v14 = vadd.f32 %v532_v43, %v448_v9 }
  0xda   : > { %v332_v16 = vadd.f32 %v331_v44, %v266_v42 }
  0xdb   : > { %v269_v46 = vpop.f32.mrf.mxu0 }
  0xdc   : > { %v429_v45 = vpop.f32.mrf.mxu2 }
  0xdd   : > { %v449_v19 = vadd.f32 %v429_v45, %v332_v16 }
  0xe0   : > { %v535_v47 = vpop.f32.mrf.mxu3 }
  0xe1   : > { %v334_v48 = vpop.f32.mrf.mxu1  ;;  %v555_v25 = vadd.f32 %v535_v47, %v449_v19 }
  0xe2   : > { %v335_v27 = vadd.f32 %v334_v48, %v269_v46 }
  0xe3   : > { %v272_v50 = vpop.f32.mrf.mxu0 }
  0xe4   : > { %v432_v49 = vpop.f32.mrf.mxu2 }
  0xe5   : > { %v450_v30 = vadd.f32 %v432_v49, %v335_v27 }
  0xe8   : > { %v538_v51 = vpop.f32.mrf.mxu3 }
  0xe9   : > { %v337_v52 = vpop.f32.mrf.mxu1  ;;  %v556_v36 = vadd.f32 %v538_v51, %v450_v30 }
  0xea   : > { %v338_v38 = vadd.f32 %v337_v52, %v272_v50 }
  0xeb   : > { %v1997_v54 = vpop.f32.mrf.mxu0 }
  0xec   : > { %v435_v53 = vpop.f32.mrf.mxu2 }
  0xed   : > { %v451_v41 = vadd.f32 %v435_v53, %v338_v38 }
  0xf0   : > { %v541_v55 = vpop.f32.mrf.mxu3 }
  0xf1   : > { %v340_v56 = vpop.f32.mrf.mxu1  ;;  %v557_v47 = vadd.f32 %v541_v55, %v451_v41 }
  0xf2   : > { %v341_v49 = vadd.f32 %v340_v56, %v1997_v54 }
  0xf3   : > { %v2001_v58 = vpop.f32.mrf.mxu0 }
  0xf4   : > { %v1999_v57 = vpop.f32.mrf.mxu2 }
  0xf5   : > { %v452_v51 = vadd.f32 %v1999_v57, %v341_v49 }
  0xf8   : > { %v2003_v59 = vpop.f32.mrf.mxu3 }
  0xf9   : > { %v2005_v60 = vpop.f32.mrf.mxu1  ;;  %v558_v6 = vadd.f32 %v2003_v59, %v452_v51 }
  0xfa   : > { %v344_v55 = vadd.f32 %v2005_v60, %v2001_v58 }
  0xfb   : > { %v2009_v62 = vpop.f32.mrf.mxu0 }
  0xfc   : > { %v2007_v61 = vpop.f32.mrf.mxu2 }
  0xfd   : > { %v453_v54 = vadd.f32 %v2007_v61, %v344_v55 }
 0x100   : > { %v2011_v0 = vpop.f32.mrf.mxu3 }
 0x101   : > { %v2013_v2 = vpop.f32.mrf.mxu1 }
 0x102   : > { %v347_v59 = vadd.f32 %v2013_v2, %v2009_v62 }
 0x103   : > { %v635_v4 = vpop.f32.mrf.mxu0 }
 0x104   : > { %v2015_v3 = vpop.f32.mrf.mxu2  ;;  %v659_v7 = vadd.f32 %v635_v4, %v553_v5 }
 0x105   : > { %v454_v60 = vadd.f32 %v2015_v3, %v347_v59 }
 0x108   : > { %v2017_v8 = vpop.f32.mrf.mxu3 }
 0x109   : > { %v741_v10 = vpop.f32.mrf.mxu1 }
 0x10a   : > { %v765_v11 = vadd.f32 %v741_v10, %v659_v7 }
 0x10b   : > { %v638_v13 = vpop.f32.mrf.mxu0 }
 0x10c   : > { %v847_v12 = vpop.f32.mrf.mxu2  ;;  %v660_v17 = vadd.f32 %v638_v13, %v554_v14  ;;  %v559_v14 = vadd.f32 %v2011_v0, %v453_v54 }
 0x10d   : > { %v871_v15 = vadd.f32 %v847_v12, %v765_v11 }
 0x110   : > { %v953_v18 = vpop.f32.mrf.mxu3 }
 0x111   : > { %v977_v20 = vadd.f32 %v953_v18, %v871_v15  ;;  %v744_v21 = vpop.f32.mrf.mxu1 }
 0x112   : > { %v766_v22 = vadd.f32 %v744_v21, %v660_v17  ;;  %v560_v21 = vadd.f32 %v2017_v8, %v454_v60 }
 0x113   : > { %985 = vst [vmem:[%s2020_s7] sm:$0xff] %v977_v20  ;;  %v641_v24 = vpop.f32.mrf.mxu0 }
 0x114   : > { %v850_v23 = vpop.f32.mrf.mxu2  ;;  %v661_v28 = vadd.f32 %v641_v24, %v555_v25 }
 0x115   : > { %v872_v26 = vadd.f32 %v850_v23, %v766_v22 }
 0x118   : > { %v956_v29 = vpop.f32.mrf.mxu3 }
 0x119   : > { %v978_v31 = vadd.f32 %v956_v29, %v872_v26  ;;  %v747_v32 = vpop.f32.mrf.mxu1 }
 0x11a   : > { %v767_v33 = vadd.f32 %v747_v32, %v661_v28 }
 0x11b   : > { %986 = vst [vmem:[%s2020_s7 + $0x8] sm:$0xff] %v978_v31  ;;  %v644_v35 = vpop.f32.mrf.mxu0 }
 0x11c   : > { %v853_v34 = vpop.f32.mrf.mxu2  ;;  %v662_v39 = vadd.f32 %v644_v35, %v556_v36 }
 0x11d   : > { %v873_v37 = vadd.f32 %v853_v34, %v767_v33 }
 0x120   : > { %v959_v40 = vpop.f32.mrf.mxu3 }
 0x121   : > { %v979_v42 = vadd.f32 %v959_v40, %v873_v37  ;;  %v750_v43 = vpop.f32.mrf.mxu1 }
 0x122   : > { %v768_v44 = vadd.f32 %v750_v43, %v662_v39 }
 0x123   : > { %987 = vst [vmem:[%s2020_s7 + $0x10] sm:$0xff] %v979_v42  ;;  %v647_v46 = vpop.f32.mrf.mxu0 }
 0x124   : > { %v856_v45 = vpop.f32.mrf.mxu2  ;;  %v663_v63 = vadd.f32 %v647_v46, %v557_v47 }
 0x125   : > { %v874_v48 = vadd.f32 %v856_v45, %v768_v44 }
 0x128   : > { %v962_v1 = vpop.f32.mrf.mxu3 }
 0x129   : > { %v980_v50 = vadd.f32 %v962_v1, %v874_v48  ;;  %v753_v52 = vpop.f32.mrf.mxu1 }
 0x12a   : > { %v769_v4 = vadd.f32 %v753_v52, %v663_v63 }
 0x12b   : > { %988 = vst [vmem:[%s2020_s7 + $0x18] sm:$0xff] %v980_v50  ;;  %v650_v5 = vpop.f32.mrf.mxu0 }
 0x12c   : > { %v859_v53 = vpop.f32.mrf.mxu2  ;;  %v664_v9 = vadd.f32 %v650_v5, %v558_v6 }
 0x12d   : > { %v875_v7 = vadd.f32 %v859_v53, %v769_v4 }
 0x130   : > { %v965_v10 = vpop.f32.mrf.mxu3 }
 0x131   : > { %v981_v56 = vadd.f32 %v965_v10, %v875_v7  ;;  %v756_v11 = vpop.f32.mrf.mxu1 }
 0x132   : > { %v770_v57 = vadd.f32 %v756_v11, %v664_v9 }
 0x133   : > { %989 = vst [vmem:[%s2020_s7 + $0x20] sm:$0xff] %v981_v56  ;;  %v653_v13 = vpop.f32.mrf.mxu0 }
 0x134   : > { %v862_v12 = vpop.f32.mrf.mxu2  ;;  %v665_v16 = vadd.f32 %v653_v13, %v559_v14 }
 0x135   : > { %v876_v15 = vadd.f32 %v862_v12, %v770_v57 }
 0x138   : > { %v968_v58 = vpop.f32.mrf.mxu3 }
 0x139   : > { %v982_v17 = vadd.f32 %v968_v58, %v876_v15  ;;  %v759_v61 = vpop.f32.mrf.mxu1 }
 0x13a   : > { %v771_v18 = vadd.f32 %v759_v61, %v665_v16 }
 0x13b   : > { %990 = vst [vmem:[%s2020_s7 + $0x28] sm:$0xff] %v982_v17  ;;  %v656_v20 = vpop.f32.mrf.mxu0 }
 0x13c   : > { %v865_v19 = vpop.f32.mrf.mxu2  ;;  %v666_v0 = vadd.f32 %v656_v20, %v560_v21 }
 0x13d   : > { %v877_v22 = vadd.f32 %v865_v19, %v771_v18 }
 0x140   : > { %v971_v62 = vpop.f32.mrf.mxu3 }
 0x141   : > { %v983_v2 = vadd.f32 %v971_v62, %v877_v22  ;;  %v762_v23 = vpop.f32.mrf.mxu1 }
 0x142   : > { %v772_v3 = vadd.f32 %v762_v23, %v666_v0 }
 0x143   : > { %991 = vst [vmem:[%s2020_s7 + $0x30] sm:$0xff] %v983_v2 }
 0x144   : > { %v868_v24 = vpop.f32.mrf.mxu2 }
 0x145   : > { %v878_v25 = vadd.f32 %v868_v24, %v772_v3 }
 0x148   : > { %v974_v8 = vpop.f32.mrf.mxu3 }
 0x149   : > { %v984_v26 = vadd.f32 %v974_v8, %v878_v25 }
 0x14b   : > { %992 = vst [vmem:[%s2020_s7 + $0x38] sm:$0xff] %v984_v26 }
 0x14c   : > { %1440 = shalt.err (!%p1437_p7)
}
 0x14d   : > { %s1487_s26 = smov 128   ;;  %s1488_s4 = smov 8  }
 0x14e   : > { %1321 = dma.vmem_to_hbm [thread:$0]  (%p1553_p11), %s1007_s12, 1024, %s1009_s17, %s994_s0, %s1487_s26, %s1487_s26, %s1488_s4  }
 0x14f PF: > { %s1023_s30 = sand.u32 1, %s1469_s13   ;;  %p1328_p8 = pnand %p1099_p9, %p1557_p12 }
 0x150   : > { %s1024_s5 = scalar_lea.sflag [#allocation6], %s1023_s30 }
 0x151   : > { %p1329_p10 = pneg %p1328_p8 }
 0x153   : > { %1464 = dma.done.wait (%p1329_p10), %s1024_s5, 1024  }
 0x154   : > { %1466 = vsyncadd (%p1329_p10), %s1024_s5, 4294966272  ;;  %p23_p0 = scmp.ge.s32.totalorder %s1532_s18, 4   ;;  %s2097_s13 = smov %s1473_s14 }
 0x155   : > { %s2098_s14 = smov %s1477_s15  ;;  %s2099_s15 = smov %s1544_s21 }
 0x156   : > { %s2100_s16 = smov %s1532_s18  ;;  %25 = sbr.rel (!%p23_p0) target bundleno = 11 (0xb), region = 77 }
 0x15b   :  { %1030 = vsyncpa [#allocation5], 1 }
 0x15c   :  { %1032 = vsyncpa [#allocation5 + $0x1], 1 }
 0x15d   :  { %1033 = vsyncpa [#allocation6], 1 }
 0x15e   :  { %1035 = vsyncpa [#allocation6 + $0x1], 1 }

</bundles_post_ra>
